<compile_context>
chip_gen: v6e
topology: v6e:2x2x1
jax: 0.10.0
libtpu: 0.0.40
codegen_flags: <defaults>
</compile_context>

<pallas_src>
import functools

import jax
import jax.numpy as jnp
from jax import lax
from jax.experimental import pallas as pl
from jax.experimental.pallas import tpu as pltpu

EPS = 1e-8


# ----------------------------- shared math helpers ---------------------------

def _sigmoid(g):
    # NOTE: jax.nn.sigmoid / approx-reciprocal is a micro-opt; kept exact here.
    return 1.0 / (1.0 + jnp.exp(-g))


def _activation(name, h):
    if name == "ReLU":
        return jnp.maximum(h, 0.0)
    if name == "ELU":
        return jnp.where(h > 0, h, jnp.exp(jnp.minimum(h, 0.0)) - 1.0)
    if name == "Sigmoid":
        return _sigmoid(h)
    if name == "Tanh":
        return jnp.tanh(h)
    raise NotImplementedError(f"Not implemented activation function {name}")


# --------------------------------- kernel ------------------------------------

def tconv_kernel(xcol_ref,              # [K_pad, B_TILE*P]  im2col (bias row folded)
                 wconv_ref,             # [C_out, K_pad]     conv weight (+bias col)
                 wtg_ref, btg_ref,      # [2*C_out, C_out], [2*C_out, 1]  trans|gate
                 gamma_ref, beta_ref,   # [C_out, 1], [C_out, 1]          GLN affine
                 o_ref,                 # [C_out, B_TILE*P]
                 *, activation, b_tile, p, c_out):
    x = xcol_ref[...]                                            # [K_pad, BP]

    # Dilated causal Conv2d (+bias, Dropout(p=0)==identity) as one MXU matmul.
    h = jnp.dot(wconv_ref[...], x, preferred_element_type=jnp.float32)   # [C_out, BP] f32
    a = _activation(activation, h)                                        # f32

    # conv_trans and conv_gated fused into a single [2*C_out, C_out] matmul.
    tg = jnp.dot(wtg_ref[...], a.astype(wtg_ref.dtype),
                 preferred_element_type=jnp.float32) + btg_ref[...]       # [2*C_out, BP]
    trans = tg[:c_out]
    gate = _sigmoid(tg[c_out:])
    y = trans * gate                                                      # [C_out, BP]

    gamma = gamma_ref[...]                                                # [C_out, 1]
    beta = beta_ref[...]

    # GlobalLayerNorm(time=False): per-batch mean/var over (C, F, T), per-channel
    # affine.  Each batch occupies a static, 128-aligned group of P lanes.
    for b in range(b_tile):
        lo = b * p
        yb = y[:, lo:lo + p]                                              # [C_out, P]
        mean = jnp.mean(yb, keepdims=True)                                # [1, 1]
        d = yb - mean
        var = jnp.mean(d * d, keepdims=True)                              # [1, 1]
        inv = pl.reciprocal(jnp.sqrt(var + EPS) + EPS)                    # exact (EUP)
        o_ref[:, lo:lo + p] = (d * inv * gamma + beta).astype(o_ref.dtype)


# --------------------------------- wrapper -----------------------------------

def _auto_b_tile(batch, p):
    """Largest divisor of batch (<=8) keeping >=2 grid steps and 128-lane blocks."""
    cap = min(8, max(1, batch // 2))
    for bt in range(cap, 0, -1):
        if batch % bt == 0 and (bt * p) % 128 == 0:
            return bt
    return batch   # fallback: single step, block == full array (always legal)


def pack_params(params, mxu_dtype=jnp.float32):
    """Pack PyTorch-shaped parameters into kernel layout ONCE (reused every call)."""
    c_out, c_in, kh, kw = params["conv_w"].shape
    k = c_in * kh * kw
    k_pad = -(-(k + 1) // 8) * 8                                  # bias row + pad to x8
    wconv = params["conv_w"].reshape(c_out, k)                    # K order = (c_in,kh,kw)
    wconv = jnp.concatenate(
        [wconv, params["conv_b"].reshape(c_out, 1),
         jnp.zeros((c_out, k_pad - k - 1), wconv.dtype)], axis=1)  # [C_out, K_pad]
    wtg = jnp.concatenate([params["trans_w"].reshape(c_out, c_out),
                           params["gate_w"].reshape(c_out, c_out)], axis=0)
    btg = jnp.concatenate([params["trans_b"], params["gate_b"]]).reshape(2 * c_out, 1)
    return {
        "wconv": wconv.astype(mxu_dtype),
        "wtg": wtg.astype(mxu_dtype),
        "btg": btg.astype(jnp.float32),
        "gamma": params["gln_w"].reshape(c_out, 1).astype(jnp.float32),
        "beta": params["gln_b"].reshape(c_out, 1).astype(jnp.float32),
    }


@functools.partial(jax.jit, static_argnames=(
    "kernel_size", "stride", "dilation", "padding", "activation", "b_tile"))
def temporal_conv2d_forward(x, packed, *, kernel_size=(3, 3), stride=(1, 1),
                            dilation=(1, 2), padding=(1, 4), activation="ELU",
                            b_tile=None):
    """x: [B, C_in, F, T] float32  ->  [B, C_out, F_out, T_out] float32."""
    B, C_in, F, T = x.shape
    KH, KW = kernel_size
    SF, ST = stride
    DF, DT = dilation
    pad_f, pad_t = padding
    C_out, K_pad = packed["wconv"].shape
    mxu_dtype = packed["wconv"].dtype

    # Causal buffer (zeros on first call) on the time axis + symmetric freq pad.
    x_pad = jnp.pad(x, ((0, 0), (0, 0), (pad_f, pad_f), (pad_t, 0)))
    F_pad, T_pad = F + 2 * pad_f, T + pad_t
    F_out = (F_pad - DF * (KH - 1) - 1) // SF + 1
    T_out = (T_pad - DT * (KW - 1) - 1) // ST + 1
    P = F_out * T_out
    K = C_in * KH * KW

    # im2col (layout plumbing, fused by jit): [K_pad, B*P], batch on lanes,
    # ones row at index K so the conv bias rides inside the matmul.
    patches = []
    for kh in range(KH):
        for kw in range(KW):
            patches.append(x_pad[:, :,
                                 kh * DF: kh * DF + (F_out - 1) * SF + 1: SF,
                                 kw * DT: kw * DT + (T_out - 1) * ST + 1: ST])
    xcol = jnp.stack(patches, axis=2)                       # [B, C_in, KH*KW, F_out, T_out]
    xcol = xcol.transpose(1, 2, 0, 3, 4).reshape(K, B, P)   # K order = (c_in, kh, kw)
    xcol = jnp.concatenate(
        [xcol, jnp.ones((1, B, P), xcol.dtype),
         jnp.zeros((K_pad - K - 1, B, P), xcol.dtype)], axis=0)
    xcol = xcol.reshape(K_pad, B * P).astype(mxu_dtype)

    if b_tile is None:
        b_tile = _auto_b_tile(B, P)
    if B % b_tile != 0:
        raise ValueError(f"b_tile={b_tile} must divide batch={B}")
    nb = B // b_tile
    BP = b_tile * P

    full = lambda shape: pl.BlockSpec(shape, lambda i: (0, 0))

    out = pl.pallas_call(
        functools.partial(tconv_kernel, activation=activation, b_tile=b_tile,
                          p=P, c_out=C_out),
        out_shape=jax.ShapeDtypeStruct((C_out, B * P), jnp.float32),
        grid_spec=pltpu.PrefetchScalarGridSpec(
            num_scalar_prefetch=0,
            grid=(nb,),
            in_specs=[
                pl.BlockSpec((K_pad, BP), lambda i: (0, i)),   # xcol: B_TILE batches/step
                full((C_out, K_pad)),                          # conv weight (+bias col)
                full((2 * C_out, C_out)),                      # [trans; gate] weight
                full((2 * C_out, 1)),                          # [trans; gate] bias
                full((C_out, 1)),                              # GLN gamma
                full((C_out, 1)),                              # GLN beta
            ],
            out_specs=pl.BlockSpec((C_out, BP), lambda i: (0, i)),
        ),
        compiler_params=pltpu.CompilerParams(
            dimension_semantics=("parallel",)),                # batch-blocks across TCs
    )(xcol, packed["wconv"], packed["wtg"], packed["btg"],
      packed["gamma"], packed["beta"])

    # Tiny layout fixup (under jit): [C_out, B, F, T] -> [B, C_out, F, T].
    return out.reshape(C_out, B, F_out, T_out).transpose(1, 0, 2, 3)


# --------------------------- pure-JAX reference -------------------------------

def temporal_conv2d_ref(x, params, *, kernel_size, stride, dilation, padding,
                        activation):
    pad_f, pad_t = padding
    x_pad = jnp.pad(x, ((0, 0), (0, 0), (pad_f, pad_f), (pad_t, 0)))
    h = lax.conv_general_dilated(
        x_pad, params["conv_w"], window_strides=stride, padding="VALID",
        rhs_dilation=dilation, dimension_numbers=("NCHW", "OIHW", "NCHW"),
        precision=lax.Precision.HIGHEST)
    h = h + params["conv_b"].reshape(1, -1, 1, 1)
    a = _activation(activation, h)
    C_out = params["conv_b"].shape[0]
    wt = params["trans_w"].reshape(C_out, C_out)
    wg = params["gate_w"].reshape(C_out, C_out)
    trans = jnp.einsum("oc,bcft->boft", wt, a, precision=lax.Precision.HIGHEST) \
        + params["trans_b"].reshape(1, -1, 1, 1)
    gate = _sigmoid(jnp.einsum("oc,bcft->boft", wg, a, precision=lax.Precision.HIGHEST)
                    + params["gate_b"].reshape(1, -1, 1, 1))
    y = trans * gate
    mean = jnp.mean(y, axis=(1, 2, 3), keepdims=True)
    var = jnp.mean((y - mean) ** 2, axis=(1, 2, 3), keepdims=True)
    return (y - mean) / (jnp.sqrt(var + EPS) + EPS) * params["gln_w"] + params["gln_b"]


# --------------------------------- params ------------------------------------

def init_params(key, c_in, c_out, kernel_size):
    """Deterministic synthetic parameters in PyTorch-native shapes."""
    KH, KW = kernel_size
    ks = jax.random.split(key, 6)

    def u(k, shape, fan_in):
        bound = 1.0 / jnp.sqrt(jnp.float32(fan_in))
        return jax.random.uniform(k, shape, jnp.float32, -bound, bound)

    return {
        "conv_w": u(ks[0], (c_out, c_in, KH, KW), c_in * KH * KW),   # nn.Conv2d weight
        "conv_b": u(ks[1], (c_out,), c_in * KH * KW),
        "trans_w": u(ks[2], (c_out, c_out, 1, 1), c_out),            # conv_trans (1x1)
        "trans_b": u(ks[3], (c_out,), c_out),
        "gate_w": u(ks[4], (c_out, c_out, 1, 1), c_out),             # conv_gated (1x1)
        "gate_b": u(ks[5], (c_out,), c_out),
        "gln_w": jnp.ones((1, c_out, 1, 1), jnp.float32),            # GlobalLayerNorm
        "gln_b": jnp.zeros((1, c_out, 1, 1), jnp.float32),
    }


if __name__ == "__main__":
    # TemporalConv2d(n_inputs=4, n_outputs=16, kernel_size=3, stride=1,
    #                dilation=(1,2), padding=(1,4), activation='ELU')
    # x: [B, C, F, T] = [2, 4, 16, 16]  ->  out: [2, 16, 16, 16]
    B, C_in, F, T = 2, 4, 16, 16
    C_out = 16
    cfg = dict(kernel_size=(3, 3), stride=(1, 1), dilation=(1, 2), padding=(1, 4),
               activation="ELU")

    key = jax.random.PRNGKey(0)
    kx, kp, kx2 = jax.random.split(key, 3)
    x = jax.random.normal(kx, (B, C_in, F, T), jnp.float32)
    params = init_params(kp, C_in, C_out, cfg["kernel_size"])

    # Pack weights ONCE (f32 MXU operands for the strict-tolerance check).
    packed = pack_params(params)

    y = jax.block_until_ready(temporal_conv2d_forward(x, packed, **cfg))
    assert y.shape == (B, C_out, F, T), y.shape
    assert bool(jnp.all(jnp.isfinite(y)))
    y_ref = temporal_conv2d_ref(x, params, **cfg)
    assert bool(jnp.allclose(y, y_ref, atol=5e-3, rtol=5e-3)), \
        float(jnp.max(jnp.abs(y - y_ref)))

    # Batched-lane path (B_TILE > 1: 8 batches -> 2 grid steps of 4 batches each).
    B2 = 8
    x2 = jax.random.normal(kx2, (B2, C_in, F, T), jnp.float32)
    y2 = jax.block_until_ready(temporal_conv2d_forward(x2, packed, **cfg))
    y2_ref = temporal_conv2d_ref(x2, params, **cfg)
    assert y2.shape == (B2, C_out, F, T), y2.shape
    assert bool(jnp.allclose(y2, y2_ref, atol=5e-3, rtol=5e-3)), \
        float(jnp.max(jnp.abs(y2 - y2_ref)))

    # bf16 MXU-operand variant (v6e/v7x native) with f32 accumulation; verified
    # against the f32 reference at a correspondingly looser tolerance.
    packed_bf16 = pack_params(params, mxu_dtype=jnp.bfloat16)
    y3 = jax.block_until_ready(temporal_conv2d_forward(x, packed_bf16, **cfg))
    assert bool(jnp.allclose(y3, y_ref, atol=5e-2, rtol=5e-2)), \
        float(jnp.max(jnp.abs(y3 - y_ref)))

    print("KERNEL_OK")
</pallas_src>

<mosaic_0001>
module attributes {stable_mosaic.version = 11 : i64} {
  func.func @tconv_kernel(%arg0: i32, %arg1: memref<40x256xf32, #tpu.memory_space<vmem>>, %arg2: memref<16x40xf32, #tpu.memory_space<vmem>>, %arg3: memref<32x16xf32, #tpu.memory_space<vmem>>, %arg4: memref<32x1xf32, #tpu.memory_space<vmem>>, %arg5: memref<16x1xf32, #tpu.memory_space<vmem>>, %arg6: memref<16x1xf32, #tpu.memory_space<vmem>>, %arg7: memref<16x256xf32, #tpu.memory_space<vmem>>) attributes {dimension_semantics = [#tpu.dimension_semantics<parallel>], iteration_bounds = array<i64: 2>, scalar_prefetch = 0 : i64, scratch_operands = 0 : i64, tpu.core_type = #tpu.core_type<tc>, window_params = [{transform_indices = @transform_0, window_bounds = array<i64: 40, 256>}, {pipeline_mode = #tpu.pipeline_mode<synchronous>, transform_indices = @transform_1, window_bounds = array<i64: 16, 40>}, {pipeline_mode = #tpu.pipeline_mode<synchronous>, transform_indices = @transform_2, window_bounds = array<i64: 32, 16>}, {pipeline_mode = #tpu.pipeline_mode<synchronous>, transform_indices = @transform_3, window_bounds = array<i64: 32, 1>}, {pipeline_mode = #tpu.pipeline_mode<synchronous>, transform_indices = @transform_4, window_bounds = array<i64: 16, 1>}, {pipeline_mode = #tpu.pipeline_mode<synchronous>, transform_indices = @transform_5, window_bounds = array<i64: 16, 1>}, {transform_indices = @transform_6, window_bounds = array<i64: 16, 256>}]} {
    %c0 = arith.constant 0 : index
    %c0_0 = arith.constant 0 : index
    %0 = vector.load %arg1[%c0, %c0_0] : memref<40x256xf32, #tpu.memory_space<vmem>>, vector<40x256xf32>
    %c0_1 = arith.constant 0 : index
    %c0_2 = arith.constant 0 : index
    %1 = vector.load %arg2[%c0_1, %c0_2] : memref<16x40xf32, #tpu.memory_space<vmem>>, vector<16x40xf32>
    %cst = arith.constant dense<0.000000e+00> : vector<16x256xf32>
    %2 = tpu.matmul %1, %0, %cst {dimension_numbers = #tpu.dot_dimension_numbers<[1], [0], [0], [1], [0, 0, 1, 1], [], []>} : vector<16x40xf32>, vector<40x256xf32>, vector<16x256xf32> -> vector<16x256xf32>
    %cst_3 = arith.constant 0.000000e+00 : f32
    %3 = vector.broadcast %cst_3 : f32 to vector<16x256xf32>
    %4 = arith.cmpf ogt, %2, %3 : vector<16x256xf32>
    %cst_4 = arith.constant 0.000000e+00 : f32
    %5 = vector.broadcast %cst_4 : f32 to vector<16x256xf32>
    %6 = arith.minimumf %2, %5 : vector<16x256xf32>
    %7 = math.exp %6 : vector<16x256xf32>
    %cst_5 = arith.constant 1.000000e+00 : f32
    %8 = vector.broadcast %cst_5 : f32 to vector<16x256xf32>
    %9 = arith.subf %7, %8 : vector<16x256xf32>
    %10 = arith.select %4, %2, %9 : vector<16x256xi1>, vector<16x256xf32>
    %c0_6 = arith.constant 0 : index
    %c0_7 = arith.constant 0 : index
    %11 = vector.load %arg3[%c0_6, %c0_7] : memref<32x16xf32, #tpu.memory_space<vmem>>, vector<32x16xf32>
    %cst_8 = arith.constant dense<0.000000e+00> : vector<32x256xf32>
    %12 = tpu.matmul %11, %10, %cst_8 {dimension_numbers = #tpu.dot_dimension_numbers<[1], [0], [0], [1], [0, 0, 1, 1], [], []>} : vector<32x16xf32>, vector<16x256xf32>, vector<32x256xf32> -> vector<32x256xf32>
    %c0_9 = arith.constant 0 : index
    %c0_10 = arith.constant 0 : index
    %13 = vector.load %arg4[%c0_9, %c0_10] : memref<32x1xf32, #tpu.memory_space<vmem>>, vector<32x1xf32>
    %14 = vector.broadcast %13 : vector<32x1xf32> to vector<32x256xf32>
    %15 = arith.addf %12, %14 : vector<32x256xf32>
    %16 = vector.extract_strided_slice %15 {offsets = [0, 0], sizes = [16, 256], strides = [1, 1]} : vector<32x256xf32> to vector<16x256xf32>
    %17 = vector.extract_strided_slice %15 {offsets = [16, 0], sizes = [16, 256], strides = [1, 1]} : vector<32x256xf32> to vector<16x256xf32>
    %cst_11 = arith.constant 0.000000e+00 : f32
    %18 = vector.broadcast %cst_11 : f32 to vector<16x256xf32>
    %19 = arith.subf %18, %17 : vector<16x256xf32>
    %20 = math.exp %19 : vector<16x256xf32>
    %cst_12 = arith.constant 1.000000e+00 : f32
    %21 = vector.broadcast %cst_12 : f32 to vector<16x256xf32>
    %22 = arith.addf %21, %20 : vector<16x256xf32>
    %cst_13 = arith.constant 1.000000e+00 : f32
    %23 = vector.broadcast %cst_13 : f32 to vector<16x256xf32>
    %24 = arith.divf %23, %22 : vector<16x256xf32>
    %25 = arith.mulf %16, %24 : vector<16x256xf32>
    %c0_14 = arith.constant 0 : index
    %c0_15 = arith.constant 0 : index
    %26 = vector.load %arg5[%c0_14, %c0_15] : memref<16x1xf32, #tpu.memory_space<vmem>>, vector<16x1xf32>
    %c0_16 = arith.constant 0 : index
    %c0_17 = arith.constant 0 : index
    %27 = vector.load %arg6[%c0_16, %c0_17] : memref<16x1xf32, #tpu.memory_space<vmem>>, vector<16x1xf32>
    %28 = vector.shape_cast %25 : vector<16x256xf32> to vector<1x16x256xf32>
    %cst_18 = arith.constant dense<0.000000e+00> : vector<1xf32>
    %29 = vector.multi_reduction <add>, %28, %cst_18 [1, 2] : vector<1x16x256xf32> to vector<1xf32>
    %30 = vector.shape_cast %29 : vector<1xf32> to vector<1x1x1xf32>
    %31 = vector.extract %30[0, 0, 0] : f32 from vector<1x1x1xf32>
    %32 = vector.broadcast %31 : f32 to vector<1x1xf32>
    %cst_19 = arith.constant 4.096000e+03 : f32
    %33 = vector.broadcast %cst_19 : f32 to vector<1x1xf32>
    %34 = arith.divf %32, %33 : vector<1x1xf32>
    %35 = vector.broadcast %34 : vector<1x1xf32> to vector<16x256xf32>
    %36 = arith.subf %25, %35 : vector<16x256xf32>
    %37 = arith.mulf %36, %36 : vector<16x256xf32>
    %38 = vector.shape_cast %37 : vector<16x256xf32> to vector<1x16x256xf32>
    %cst_20 = arith.constant dense<0.000000e+00> : vector<1xf32>
    %39 = vector.multi_reduction <add>, %38, %cst_20 [1, 2] : vector<1x16x256xf32> to vector<1xf32>
    %40 = vector.shape_cast %39 : vector<1xf32> to vector<1x1x1xf32>
    %41 = vector.extract %40[0, 0, 0] : f32 from vector<1x1x1xf32>
    %42 = vector.broadcast %41 : f32 to vector<1x1xf32>
    %cst_21 = arith.constant 4.096000e+03 : f32
    %43 = vector.broadcast %cst_21 : f32 to vector<1x1xf32>
    %44 = arith.divf %42, %43 : vector<1x1xf32>
    %cst_22 = arith.constant 9.99999993E-9 : f32
    %45 = vector.broadcast %cst_22 : f32 to vector<1x1xf32>
    %46 = arith.addf %44, %45 : vector<1x1xf32>
    %47 = math.sqrt %46 : vector<1x1xf32>
    %cst_23 = arith.constant 9.99999993E-9 : f32
    %48 = vector.broadcast %cst_23 : f32 to vector<1x1xf32>
    %49 = arith.addf %47, %48 : vector<1x1xf32>
    %50 = tpu.reciprocal %49 : vector<1x1xf32> -> vector<1x1xf32>
    %51 = vector.broadcast %50 : vector<1x1xf32> to vector<16x256xf32>
    %52 = arith.mulf %36, %51 : vector<16x256xf32>
    %53 = vector.broadcast %26 : vector<16x1xf32> to vector<16x256xf32>
    %54 = arith.mulf %52, %53 : vector<16x256xf32>
    %55 = vector.broadcast %27 : vector<16x1xf32> to vector<16x256xf32>
    %56 = arith.addf %54, %55 : vector<16x256xf32>
    %c0_24 = arith.constant 0 : index
    %c0_25 = arith.constant 0 : index
    %57 = vector.load %arg7[%c0_24, %c0_25] : memref<16x256xf32, #tpu.memory_space<vmem>>, vector<16x256xf32>
    tpu.vector_store %arg7[%c0_24, %c0_25], %56 {strides = array<i32>} : memref<16x256xf32, #tpu.memory_space<vmem>>, vector<16x256xf32>,
    return
  }
  func.func @transform_0(%arg0: i32) -> (i32, i32) {
    %c0_i32 = arith.constant 0 : i32
    %c0_i32_0 = arith.constant 0 : i32
    return %c0_i32, %arg0 : i32, i32
  }
  func.func @transform_1(%arg0: i32) -> (i32, i32) {
    %c0_i32 = arith.constant 0 : i32
    %c0_i32_0 = arith.constant 0 : i32
    %c0_i32_1 = arith.constant 0 : i32
    return %c0_i32, %c0_i32_0 : i32, i32
  }
  func.func @transform_2(%arg0: i32) -> (i32, i32) {
    %c0_i32 = arith.constant 0 : i32
    %c0_i32_0 = arith.constant 0 : i32
    %c0_i32_1 = arith.constant 0 : i32
    return %c0_i32, %c0_i32_0 : i32, i32
  }
  func.func @transform_3(%arg0: i32) -> (i32, i32) {
    %c0_i32 = arith.constant 0 : i32
    %c0_i32_0 = arith.constant 0 : i32
    %c0_i32_1 = arith.constant 0 : i32
    return %c0_i32, %c0_i32_0 : i32, i32
  }
  func.func @transform_4(%arg0: i32) -> (i32, i32) {
    %c0_i32 = arith.constant 0 : i32
    %c0_i32_0 = arith.constant 0 : i32
    %c0_i32_1 = arith.constant 0 : i32
    return %c0_i32, %c0_i32_0 : i32, i32
  }
  func.func @transform_5(%arg0: i32) -> (i32, i32) {
    %c0_i32 = arith.constant 0 : i32
    %c0_i32_0 = arith.constant 0 : i32
    %c0_i32_1 = arith.constant 0 : i32
    return %c0_i32, %c0_i32_0 : i32, i32
  }
  func.func @transform_6(%arg0: i32) -> (i32, i32) {
    %c0_i32 = arith.constant 0 : i32
    %c0_i32_0 = arith.constant 0 : i32
    return %c0_i32, %arg0 : i32, i32
  }
}

</mosaic_0001>

<bundles_post_ra>
// kernel: temporal_conv2d_forward.1
= control target key start
LH: loop header
LB: loop body
LE: loop exit
PB: predicated region body
PF: predicated region fallthrough
CT: control target
= control target key end

     0   :  { %s888_s21 = smov 0   ;;  %s890_s22 = smov 0   ;;  %s1000_s0 = inlined_call_operand.vmem [shape: f32[40,512], index: 0, kind: input, shape index: {}]   ;;  %s1001_s1 = inlined_call_operand.vmem [shape: f32[16,40], index: 1, kind: input, shape index: {}]   ;;  %s1002_s2 = inlined_call_operand.vmem [shape: f32[32,16], index: 2, kind: input, shape index: {}]   ;;  %s1003_s3 = inlined_call_operand.vmem [shape: f32[32,1], index: 3, kind: input, shape index: {}]   ;;  %s1004_s4 = inlined_call_operand.vmem [shape: f32[16,1], index: 4, kind: input, shape index: {}]   ;;  %s1005_s5 = inlined_call_operand.vmem [shape: f32[16,1], index: 5, kind: input, shape index: {}]   ;;  %s1006_s6 = inlined_call_operand.vmem [shape: f32[16,512], index: 6, kind: output, shape index: {}]  }
   0x1   :  { %s892_s23 = smov 0  }
   0x2 LB: > { %s740_s24 = sadd.s32 4294967295, %s849_s23   ;;  %s905_s25 = sadd.s32 1, %s849_s23   ;;  %s849_s23 = sphi %s892_s23, %s1010_s23   ;;  %s845_s22 = sphi %s890_s22, %s1009_s22   ;;  %s841_s21 = sphi %s888_s21, %s1008_s21  }
   0x3   : > { %s20_s26 = ssub.s32 %s849_s23, %s905_s25  ;;  %s23_s27 = sadd.s32 1, %s845_s22 }
   0x4   : > { %p21_p0 = scmp.eq.s32.totalorder %s20_s26, 0  ;;  %p30_p1 = scmp.ne.s32.totalorder %s845_s22, %s841_s21 }
   0x5   : > { %p31_p2 = scmp.eq.s32.totalorder %s849_s23, 0  ;;  %p165_p3 = scmp.eq.s32.totalorder %s740_s24, 1 }
   0x6   : > { %s916_s28 = scalar_select %p21_p0, %s845_s22, %s23_s27  }
   0x7   : > { %p32_p4 = por %p31_p2, %p30_p1  ;;  %p918_p5 = por %p165_p3, %p30_p1 }
   0x8   : > { %p743_p6 = scmp.ge.s32.totalorder %s849_s23, 2 }
   0xa   : > { %202 = sbr.rel (%p743_p6) target bundleno = 24 (0x18), region = 36 }
   0xf   : > { %205 = sbr.rel (!%p32_p4) target bundleno = 24 (0x18), region = 40  ;;  %s207_s30 = sand.u32 (%p32_p4), 1, %s845_s22  }
  0x10   : > { %s763_s7 = sshll.u32 (%p32_p4), %s849_s23, 4  ;;  %s765_s8 = smul.u32 (%p32_p4), 80, %s207_s30 }
  0x11   : > { %s212_s11 = scalar_lea.vmem (%p32_p4), %s1000_s0, %s763_s7 }
  0x12   : > { %v225_v0 = vld [vmem:[%s212_s11] sm:$0xff] (%p32_p4)  ;;  %v227_v1 = vld [vmem:[%s212_s11 + $0x8] sm:$0xff] (%p32_p4)  ;;  %s209_s12 = scalar_lea.vmem (%p32_p4), [#allocation2], %s765_s8 }
  0x13   : > { %v229_v2 = vld [vmem:[%s212_s11 + $0x20] sm:$0xff] (%p32_p4)  ;;  %v231_v3 = vld [vmem:[%s212_s11 + $0x28] sm:$0xff] (%p32_p4)  ;;  %226 = vst [vmem:[%s209_s12] sm:$0xff] (%p32_p4), %v225_v0  ;;  %228 = vst [vmem:[%s209_s12 + $0x8] sm:$0xff] (%p32_p4), %v227_v1 }
  0x14   : > { %v233_v4 = vld [vmem:[%s212_s11 + $0x40] sm:$0xff]  ;;  %v235_v5 = vld [vmem:[%s212_s11 + $0x48] sm:$0xff]  ;;  %230 = vst [vmem:[%s209_s12 + $0x10] sm:$0xff] %v229_v2  ;;  %232 = vst [vmem:[%s209_s12 + $0x18] sm:$0xff] %v231_v3 }
  0x15   : > { %234 = vst [vmem:[%s209_s12 + $0x20] sm:$0xff] %v233_v4  ;;  %236 = vst [vmem:[%s209_s12 + $0x28] sm:$0xff] %v235_v5  ;;  %v237_v6 = vld [vmem:[%s212_s11 + $0x60] sm:$0xff]  ;;  %v239_v7 = vld [vmem:[%s212_s11 + $0x68] sm:$0xff] }
  0x16   : > { %v241_v8 = vld [vmem:[%s212_s11 + $0x80] sm:$0xff]  ;;  %238 = vst [vmem:[%s209_s12 + $0x30] sm:$0xff] %v237_v6  ;;  %240 = vst [vmem:[%s209_s12 + $0x38] sm:$0xff] %v239_v7  ;;  %v243_v9 = vld [vmem:[%s212_s11 + $0x88] sm:$0xff] }
  0x17   : > { %242 = vst [vmem:[%s209_s12 + $0x40] sm:$0xff] %v241_v8  ;;  %244 = vst [vmem:[%s209_s12 + $0x48] sm:$0xff] %v243_v9 }
  0x18 PF: > { %p746_p7 = scmp.ge.s32.totalorder %s849_s23, 1  ;;  %p249_p8 = scmp.lt.s32.totalorder %s849_s23, 3 }
  0x1a   : > { %p250_p9 = pnand %p746_p7, %p249_p8 }
  0x1b   : > { %s256_s13 = sand.u32 (!%p250_p9), 1, %s841_s21  }
  0x1c   : > { %253 = sbr.rel (%p250_p9) target bundleno = 984 (0x3d8), region = 63 }
  0x1d   : > { %s766_s14 = smul.u32 (!%p250_p9), 80, %s256_s13 }
  0x1f   : > { %s258_s15 = scalar_lea.vmem (!%p250_p9), [#allocation2], %s766_s14  ;;  %s747_s14 = sshll.u32 (!%p250_p9), %s256_s13, 5 }
  0x21   : > { %v851_v10 = vmov 0.0   ;;  %v295_v11 = vld [vmem:[%s258_s15 + $0x48] sm:$0xff]  ;;  %v294_v12 = vld [vmem:[%s258_s15 + $0x40] sm:$0xff]  ;;  %v293_v13 = vld [vmem:[%s258_s15 + $0x38] sm:$0xff]  ;;  %vm298_vm0 = vcmask 326656   ;;  %v852_v25 = vmov 0  }
  0x22   : > { %369 = vmatprep.mubr.f32.mxu0 %v851_v10  ;;  %511 = vmatprep.mubr.f32.mxu1 %v851_v10  ;;  %v292_v14 = vld [vmem:[%s258_s15 + $0x30] sm:$0xff]  ;;  %v291_v15 = vld [vmem:[%s258_s15 + $0x28] sm:$0xff]  ;;  %v290_v16 = vld [vmem:[%s258_s15 + $0x20] sm:$0xff]  ;;  %vm434_vm5 = vcmask 130048   ;;  %s764_s21 = sshll.u32 (%p918_p5), %s740_s24, 4 }
  0x23   : > { %327 = vmatprep.subr.mxu0 %v295_v11  ;;  %v289_v17 = vld [vmem:[%s258_s15 + $0x18] sm:$0xff]  ;;  %v288_v18 = vld [vmem:[%s258_s15 + $0x10] sm:$0xff]  ;;  %v287_v19 = vld [vmem:[%s258_s15 + $0x8] sm:$0xff]  ;;  %798 = vset.pattern.permute.xlu1 %v852_v25  ;;  %s660_s17 = scalar_lea.vmem (%p918_p5), %s1006_s6, %s764_s21 }
  0x24   : > { %328 = vmatpush1.msra.mxu0 %v294_v12  ;;  %v286_v20 = vld [vmem:[%s258_s15] sm:$0xff]  ;;  %v297_v22 = vld [vmem:[%s1001_s1 + $0x8] sm:$0xff]  ;;  %797 = vset.pattern.permute.xlu0 %v852_v25  ;;  %v413_v27 = vld [vmem:[%s1003_s3 + $0x18] sm:$0xff]  ;;  %s283_s15 = scalar_lea.vmem [#allocation3], %s747_s14 }
  0x25   : > { %329 = vmatprep.subr.mxu0 %v293_v13  ;;  %v296_v21 = vld [vmem:[%s1001_s1] sm:$0xff]  ;;  %v412_v24 = vld [vmem:[%s1003_s3 + $0x10] sm:$0xff]  ;;  %v411_v26 = vld [vmem:[%s1003_s3 + $0x8] sm:$0xff] }
  0x26   : > { %330 = vmatpush1.msra.mxu0 %v292_v14  ;;  %v410_v23 = vld [vmem:[%s1003_s3] sm:$0xff]  ;;  %426 = vperm.xlu0 %797, %v412_v24   ;;  %v407_v53 = vld [vmem:[%s1002_s2 + $0x8] sm:$0xff]  ;;  %v408_v54 = vld [vmem:[%s1002_s2 + $0x10] sm:$0xff] }
  0x27   : > { %331 = vmatprep.subr.mxu0 %v291_v15  ;;  %416 = vperm.xlu1 %798, %v410_v23   ;;  %v406_v51 = vld [vmem:[%s1002_s2] sm:$0xff]  ;;  %v409_v55 = vld [vmem:[%s1002_s2 + $0x18] sm:$0xff] }
  0x28   : > { %332 = vmatpush1.msra.mxu0 %v290_v16 }
  0x29   : > { %333 = vmatprep.subr.mxu0 %v289_v17 }
  0x2a   : > { %334 = vmatpush1.msra.mxu0 %v288_v18  ;;  %431 = vperm.xlu0 %797, %v413_v27  }
  0x2b   : > { %335 = vmatprep.subr.mxu0 %v287_v19  ;;  %421 = vperm.xlu1 %798, %v411_v26  }
  0x2c   : > { %336 = vmatpush1.msra.mxu0 %v286_v20 }
  0x2d   : > { %748 = vmatmul.mubr.msk.f32.vlgmr.msra.gmra.mxu0 %vm298_vm0, %v296_v21 }
  0x2e   : > { %375 = vmatprep.mubr.f32.mxu0 %v851_v10 }
  0x31   : > { %749 = vmatmul.mubr.msk.f32.gmra.mxu0 %vm298_vm0, %v297_v22 }
  0xa1   : > { %v427_v59 = vpop.permute.xlu0 %426 }
  0xa2   : > { %v417_v22 = vpop.permute.xlu1 %416 }
  0xa5   : > { %v432_v2 = vpop.permute.xlu0 %431 }
  0xa6   : > { %v422_v24 = vpop.permute.xlu1 %421 }
  0xed   : > { %v371_v28 = vpop.f32.mrf.mxu0 }
  0xee   : > { %v386_v29 = vmin.f32 %v371_v28, 0.0  ;;  %vm382_vm4 = vcmp.gt.f32.partialorder %v371_v28, 0.0 }
  0xef   : > { %v373_v30 = vpop.f32.mrf.mxu0 }
  0xf0   : > { %v387_v31 = vmin.f32 %v373_v30, 0.0  ;;  %v390_v35 = vmul.f32 1.442695, %v386_v29  ;;  %vm383_vm3 = vcmp.gt.f32.partialorder %v373_v30, 0.0 }
  0xf1   : > { %v377_v32 = vpop.f32.mrf.mxu0 }
  0xf2   : > { %v392_v33 = vmul.f32 1.442695, %v387_v31  ;;  %v388_v34 = vmin.f32 %v377_v32, 0.0  ;;  %vm384_vm2 = vcmp.gt.f32.partialorder %v377_v32, 0.0 }
  0xf3   : > { %v379_v36 = vpop.f32.mrf.mxu0 }
  0xf4   : > { %v394_v37 = vmul.f32 1.442695, %v388_v34  ;;  %v389_v38 = vmin.f32 %v379_v36, 0.0  ;;  %799 = vpow2.f32 %v392_v33  ;;  %vm385_vm1 = vcmp.gt.f32.partialorder %v379_v36, 0.0 }
  0xf6   : > { %801 = vpow2.f32 %v394_v37  ;;  %v396_v39 = vmul.f32 1.442695, %v389_v38 }
  0xf7   : > { %803 = vpow2.f32 %v390_v35 }
  0xf8   : > { %805 = vpow2.f32 %v396_v39  ;;  %v564_v39 = vld [vmem:[%s1004_s4] sm:$0xff] }
 0x101   : > { %v800_v40 = vpop.eup %799 }
 0x102   : > { %v751_v46 = vadd.f32 -1.0, %v800_v40  ;;  %v566_v40 = vld [vmem:[%s1005_s5] sm:$0xff] }
 0x103   : > { %v802_v41 = vpop.eup %801 }
 0x104   : > { %v804_v42 = vpop.eup %803  ;;  %v752_v44 = vadd.f32 -1.0, %v802_v41  ;;  %v403_v50 = vsel %vm383_vm3, %v373_v30, %v751_v46 }
 0x105   : > { %v806_v43 = vpop.eup %805  ;;  %v750_v47 = vadd.f32 -1.0, %v804_v42 }
 0x106   : > { %v753_v45 = vadd.f32 -1.0, %v806_v43  ;;  %v404_v49 = vsel %vm384_vm2, %v377_v32, %v752_v44 }
 0x107   : > { %v402_v52 = vsel %vm382_vm4, %v371_v28, %v750_v47 }
 0x108   : > { %v405_v48 = vsel %vm385_vm1, %v379_v36, %v753_v45 }
 0x109   : > { %475 = vmatprep.subr.mxu1 %v405_v48 }
 0x10a   : > { %476 = vmatpush1.msra.mxu1 %v404_v49 }
 0x10b   : > { %477 = vmatprep.subr.mxu1 %v403_v50 }
 0x10c   : > { %478 = vmatpush1.msra.mxu1 %v402_v52 }
 0x10d   : > { %754 = vmatmul.mubr.msk.f32.vlgmr.msra.gmra.mxu1 %vm434_vm5, %v406_v51 }
 0x10e   : > { %517 = vmatprep.mubr.f32.mxu1 %v851_v10 }
 0x111   : > { %755 = vmatmul.mubr.msk.f32.gmra.mxu1 %vm434_vm5, %v407_v53 }
 0x112   : > { %523 = vmatprep.mubr.f32.mxu1 %v851_v10 }
 0x115   : > { %756 = vmatmul.mubr.msk.f32.gmra.mxu1 %vm434_vm5, %v408_v54 }
 0x116   : > { %529 = vmatprep.mubr.f32.mxu1 %v851_v10 }
 0x119   : > { %757 = vmatmul.mubr.msk.f32.gmra.mxu1 %vm434_vm5, %v409_v55 }
 0x1cd   : > { %v513_v56 = vpop.f32.mrf.mxu1 }
 0x1ce   : > { %v514_v25 = vadd.f32 %v513_v56, %v417_v22 }
 0x1cf   : > { %v515_v57 = vpop.f32.mrf.mxu1 }
 0x1d0   : > { %v516_v26 = vadd.f32 %v515_v57, %v417_v22 }
 0x1d1   : > { %v519_v58 = vpop.f32.mrf.mxu1 }
 0x1d2   : > { %v520_v28 = vadd.f32 %v519_v58, %v422_v24 }
 0x1d3   : > { %v521_v60 = vpop.f32.mrf.mxu1 }
 0x1d4   : > { %v522_v32 = vadd.f32 %v521_v60, %v422_v24 }
 0x1d5   : > { %v525_v61 = vpop.f32.mrf.mxu1 }
 0x1d6   : > { %v526_v62 = vadd.f32 %v525_v61, %v427_v59  ;;  %v565_v61 = vld [vmem:[%s1004_s4 + $0x8] sm:$0xff] }
 0x1d7   : > { %v527_v63 = vpop.f32.mrf.mxu1 }
 0x1d8   : > { %v536_v0 = vsub.f32 0.0, %v526_v62  ;;  %v528_v1 = vadd.f32 %v527_v63, %v427_v59  ;;  %v567_v62 = vld [vmem:[%s1005_s5 + $0x8] sm:$0xff] }
 0x1d9   : > { %v531_v3 = vpop.f32.mrf.mxu1 }
 0x1da   : > { %v540_v4 = vmul.f32 1.442695, %v536_v0  ;;  %v537_v5 = vsub.f32 0.0, %v528_v1  ;;  %v532_v6 = vadd.f32 %v531_v3, %v432_v2 }
 0x1db   : > { %v533_v7 = vpop.f32.mrf.mxu1 }
 0x1dc   : > { %807 = vpow2.f32 %v540_v4  ;;  %v542_v8 = vmul.f32 1.442695, %v537_v5  ;;  %v538_v9 = vsub.f32 0.0, %v532_v6  ;;  %v534_v10 = vadd.f32 %v533_v7, %v432_v2 }
 0x1de   : > { %809 = vpow2.f32 %v542_v8  ;;  %v544_v11 = vmul.f32 1.442695, %v538_v9  ;;  %v539_v12 = vsub.f32 0.0, %v534_v10 }
 0x1e0   : > { %811 = vpow2.f32 %v544_v11  ;;  %v546_v13 = vmul.f32 1.442695, %v539_v12 }
 0x1e2   : > { %813 = vpow2.f32 %v546_v13 }
 0x1e9   : > { %v808_v14 = vpop.eup %807 }
 0x1ea   : > { %v548_v15 = vadd.f32 1.0, %v808_v14 }
 0x1eb   : > { %v810_v16 = vpop.eup %809 }
 0x1ec   : > { %815 = vrcp.f32 %v548_v15  ;;  %v549_v17 = vadd.f32 1.0, %v810_v16 }
 0x1ed   : > { %v812_v18 = vpop.eup %811 }
 0x1ee   : > { %817 = vrcp.f32 %v549_v17  ;;  %v550_v19 = vadd.f32 1.0, %v812_v18 }
 0x1ef   : > { %v814_v20 = vpop.eup %813 }
 0x1f0   : > { %819 = vrcp.f32 %v550_v19  ;;  %v551_v21 = vadd.f32 1.0, %v814_v20 }
 0x1f2   : > { %821 = vrcp.f32 %v551_v21 }
 0x1f9   : > { %v816_v23 = vpop.eup %815 }
 0x1fa   : > { %v560_v29 = vmul.f32 %v816_v23, %v514_v25 }
 0x1fb   : > { %v818_v27 = vpop.eup %817 }
 0x1fc   : > { %v561_v30 = vmul.f32 %v818_v27, %v516_v26 }
 0x1fd   : > { %v820_v31 = vpop.eup %819 }
 0x1fe   : > { %v562_v33 = vmul.f32 %v820_v31, %v520_v28  ;;  %v568_v34 = vadd.f32 %v561_v30, %v560_v29 }
 0x1ff   : > { %v822_v35 = vpop.eup %821 }
 0x200   : > { %v563_v36 = vmul.f32 %v822_v35, %v522_v32  ;;  %v569_v37 = vadd.f32 %v568_v34, %v562_v33 }
 0x202   : > { %v570_v38 = vadd.f32 %v569_v37, %v563_v36 }
 0x204   : > { %571 = vadd.xlane.f32.xlu0 %v570_v38 }
 0x21a   : > { %621 = vperm.xlu0 %797, %v564_v39  }
 0x21e   : > { %635 = vperm.xlu0 %797, %v566_v40  }
 0x28d   : > { %v572_v41 = vpop.xlane.xlu0 %571 }
 0x28e   : > { %v573_v42 = vrot.slane %v572_v41, 4 }
 0x290   : > { %v574_v43 = vadd.f32 %v573_v42, %v572_v41 }
 0x292   : > { %v575_v44 = vrot.slane %v574_v43, 2 }
 0x294   : > { %v576_v45 = vadd.f32 %v575_v44, %v574_v43 }
 0x295   : > { %v622_v15 = vpop.permute.xlu0 %621 }
 0x296   : > { %v577_v46 = vrot.slane %v576_v45, 1 }
 0x298   : > { %v578_v47 = vadd.f32 %v577_v46, %v576_v45 }
 0x299   : > { %v636_v26 = vpop.permute.xlu0 %635 }
 0x29a   : > { %767 = vpush %v578_v47 }
 0x2cb   : > { %s768_s7 = spop %767 }
 0x2cc   : > { %v580_v48 = vstv %s768_s7 }
 0x2cd   : > { %v582_v49 = vmul.f32 0.00024414063, %v580_v48 }
 0x2cf   : > { %v583_v50 = vsub.f32 %v560_v29, %v582_v49  ;;  %v584_v51 = vsub.f32 %v561_v30, %v582_v49  ;;  %v585_v52 = vsub.f32 %v562_v33, %v582_v49  ;;  %v586_v53 = vsub.f32 %v563_v36, %v582_v49 }
 0x2d1   : > { %v587_v54 = vmul.f32 %v583_v50, %v583_v50  ;;  %v588_v55 = vmul.f32 %v584_v51, %v584_v51  ;;  %v589_v56 = vmul.f32 %v585_v52, %v585_v52  ;;  %v590_v58 = vmul.f32 %v586_v53, %v586_v53 }
 0x2d3   : > { %v591_v57 = vadd.f32 %v588_v55, %v587_v54 }
 0x2d5   : > { %v592_v59 = vadd.f32 %v591_v57, %v589_v56 }
 0x2d7   : > { %v593_v60 = vadd.f32 %v592_v59, %v590_v58 }
 0x2d9   : > { %594 = vadd.xlane.f32.xlu1 %v593_v60 }
 0x2ea   : > { %626 = vperm.xlu1 %798, %v565_v61  }
 0x2ee   : > { %640 = vperm.xlu1 %798, %v567_v62  }
 0x362   : > { %v595_v63 = vpop.xlane.xlu1 %594 }
 0x363   : > { %v596_v0 = vrot.slane %v595_v63, 4 }
 0x365   : > { %v597_v1 = vadd.f32 %v596_v0, %v595_v63 }
 0x366   : > { %v627_v16 = vpop.permute.xlu1 %626 }
 0x367   : > { %v598_v2 = vrot.slane %v597_v1, 2 }
 0x369   : > { %v599_v3 = vadd.f32 %v598_v2, %v597_v1 }
 0x36a   : > { %v641_v27 = vpop.permute.xlu1 %640 }
 0x36b   : > { %v600_v4 = vrot.slane %v599_v3, 1 }
 0x36d   : > { %v601_v5 = vadd.f32 %v600_v4, %v599_v3 }
 0x36f   : > { %769 = vpush %v601_v5 }
 0x3a0   : > { %s770_s12 = spop %769 }
 0x3a1   : > { %v603_v6 = vstv %s770_s12 }
 0x3a2   : > { %v604_v7 = vmul.f32 0.00024414063, %v603_v6 }
 0x3a4   : > { %v605_v8 = vadd.f32 1e-08, %v604_v7 }
 0x3a6   : > { %823 = vrsqrt.f32 %v605_v8  ;;  %vm608_vm6 = vcmp.eq.f32.partialorder %v605_v8, inf  ;;  %v611_v11 = vand.u32 2147483648, %v605_v8  ;;  %vm610_vm7 = vcmp.eq.f32.partialorder %v605_v8, 0.0 }
 0x3b3   : > { %v824_v9 = vpop.eup %823 }
 0x3b4   : > { %v607_v10 = vmul.f32 %v824_v9, %v605_v8 }
 0x3b6   : > { %v609_v12 = vsel %vm608_vm6, %v605_v8, %v607_v10 }
 0x3b7   : > { %v612_v13 = vsel %vm610_vm7, %v611_v11, %v609_v12 }
 0x3b8   : > { %v613_v14 = vadd.f32 1e-08, %v612_v13 }
 0x3ba   : > { %825 = vrcp.f32 %v613_v14 }
 0x3c7   : > { %v826_v17 = vpop.eup %825 }
 0x3c8   : > { %v615_v18 = vmul.f32 %v826_v17, %v583_v50  ;;  %v616_v19 = vmul.f32 %v826_v17, %v584_v51  ;;  %v617_v20 = vmul.f32 %v826_v17, %v585_v52  ;;  %v618_v21 = vmul.f32 %v826_v17, %v586_v53 }
 0x3ca   : > { %v629_v22 = vmul.f32 %v622_v15, %v615_v18  ;;  %v630_v23 = vmul.f32 %v622_v15, %v616_v19  ;;  %v631_v24 = vmul.f32 %v627_v16, %v617_v20  ;;  %v632_v25 = vmul.f32 %v627_v16, %v618_v21 }
 0x3cb   : > { %657 = sbr.rel (!%p918_p5) target bundleno = 984 (0x3d8), region = 71 }
 0x3cc   : > { %v643_v28 = vadd.f32 %v636_v26, %v629_v22  ;;  %v644_v29 = vadd.f32 %v636_v26, %v630_v23  ;;  %v645_v30 = vadd.f32 %v641_v27, %v631_v24  ;;  %v646_v31 = vadd.f32 %v641_v27, %v632_v25 }
 0x3ce   : > { %647 = vst [vmem:[%s283_s15] sm:$0xff] %v643_v28  ;;  %648 = vst [vmem:[%s283_s15 + $0x8] sm:$0xff] %v644_v29 }
 0x3cf   : > { %649 = vst [vmem:[%s283_s15 + $0x10] sm:$0xff] %v645_v30  ;;  %650 = vst [vmem:[%s283_s15 + $0x18] sm:$0xff] %v646_v31 }
 0x3d5   : > { %v673_v32 = vld [vmem:[%s283_s15] sm:$0xff]  ;;  %v675_v33 = vld [vmem:[%s283_s15 + $0x8] sm:$0xff] }
 0x3d6   : > { %v677_v34 = vld [vmem:[%s283_s15 + $0x10] sm:$0xff]  ;;  %v679_v35 = vld [vmem:[%s283_s15 + $0x18] sm:$0xff]  ;;  %674 = vst [vmem:[%s660_s17] sm:$0xff] %v673_v32  ;;  %676 = vst [vmem:[%s660_s17 + $0x8] sm:$0xff] %v675_v33 }
 0x3d7   : > { %678 = vst [vmem:[%s660_s17 + $0x20] sm:$0xff] %v677_v34  ;;  %680 = vst [vmem:[%s660_s17 + $0x28] sm:$0xff] %v679_v35 }
 0x3d8 PF: > { %p13_p10 = scmp.ge.s32.totalorder %s905_s25, 4   ;;  %s1008_s21 = smov %s845_s22 }
 0x3d9   : > { %s1009_s22 = smov %s916_s28  ;;  %s1010_s23 = smov %s905_s25 }
 0x3da   :  { %15 = sbr.rel (!%p13_p10) target bundleno = 2 (0x2), region = 125 }

</bundles_post_ra>
